<compile_context>
chip_gen: v6e
topology: v6e:2x2x1
jax: 0.10.0
libtpu: 0.0.40
codegen_flags: <defaults>
</compile_context>

<pallas_src>
import functools
import math

import jax
import jax.numpy as jnp
from jax.experimental import pallas as pl
from jax.experimental.pallas import tpu as pltpu


_NEG_BIG = -1e32
_PAD_TAG_BIAS = -1e30


def _round_up(x, m):
    return ((x + m - 1) // m) * m


# ----------------------------- Multi-head attention -----------------------------
def mha_kernel(x_ref, wqkv_ref, bqkv_ref, wout_ref, bout_ref,
               out_ref, attn_ref, acc_ref, *, hd_pad):
    """One (batch, head) grid point.  Accumulates the out-projection over heads."""
    h = pl.program_id(1)
    _, S, E = x_ref.shape
    x = x_ref[0]                                                    # (S, E) bf16

    # per-head fused QKV projection; the 1/sqrt(head_size) scale is folded into
    # the q weight/bias columns at param-prep time (free at load).
    qkv = (jnp.dot(x, wqkv_ref[0], preferred_element_type=jnp.float32)
           + bqkv_ref[0])                                           # (S, 3*hd_pad) f32
    q = qkv[:, 0:hd_pad].astype(jnp.bfloat16)                       # lane-aligned slices
    k = qkv[:, hd_pad:2 * hd_pad].astype(jnp.bfloat16)
    v = qkv[:, 2 * hd_pad:].astype(jnp.bfloat16)

    # scores: contraction over the (padded) head dim -> fills MXU K granularity.
    logits = jax.lax.dot_general(q, k, (((1,), (1,)), ((), ())),
                                 preferred_element_type=jnp.float32)  # (S, S)
    m = jnp.max(logits, axis=-1, keepdims=True)
    e = jnp.exp(logits - m)
    attn = e * pl.reciprocal(jnp.sum(e, axis=-1, keepdims=True), approx=True)
    attn_ref[...] = attn.reshape(1, 1, S, S)                        # direct (B,nh,S,S) store

    vals = jnp.dot(attn.astype(jnp.bfloat16), v,
                   preferred_element_type=jnp.float32)              # (S, hd_pad)

    @pl.when(h == 0)
    def _():
        acc_ref[...] = jnp.broadcast_to(bout_ref[...], acc_ref.shape)  # init with out bias

    acc_ref[...] += jnp.dot(vals.astype(jnp.bfloat16), wout_ref[0],
                            preferred_element_type=jnp.float32)     # head contribution

    @pl.when(h == pl.num_programs(1) - 1)
    def _():
        out_ref[...] = acc_ref[...].reshape(1, S, E).astype(out_ref.dtype)


def multi_head_attention(x, wqkv, bqkv, wout, bout, num_head):
    """x: (B, S, E) bf16. Returns (B, S, E) bf16 output and (B, nh, S, S) f32 maps."""
    B, S, E = x.shape
    nh = num_head
    hd_p = wqkv.shape[2] // 3
    kernel = functools.partial(mha_kernel, hd_pad=hd_p)
    out, attn = pl.pallas_call(
        kernel,
        out_shape=(jax.ShapeDtypeStruct((B, S, E), jnp.bfloat16),
                   jax.ShapeDtypeStruct((B, nh, S, S), jnp.float32)),
        grid=(B, nh),
        in_specs=[
            pl.BlockSpec((1, S, E), lambda b, h: (b, 0, 0)),
            pl.BlockSpec((1, E, 3 * hd_p), lambda b, h: (h, 0, 0)),
            pl.BlockSpec((1, 1, 3 * hd_p), lambda b, h: (h, 0, 0)),
            pl.BlockSpec((1, hd_p, E), lambda b, h: (h, 0, 0)),
            pl.BlockSpec((1, E), lambda b, h: (0, 0)),
        ],
        out_specs=(
            pl.BlockSpec((1, S, E), lambda b, h: (b, 0, 0)),
            pl.BlockSpec((1, 1, S, S), lambda b, h: (b, h, 0, 0)),
        ),
        scratch_shapes=[pltpu.VMEM((S, E), jnp.float32)],
        compiler_params=pltpu.CompilerParams(
            dimension_semantics=("parallel", "arbitrary")),
    )(x, wqkv, bqkv, wout, bout)
    return out, attn


# -------------------- Fused BiLSTM (packed semantics) + tagging decoder --------------------
def bilstm_decoder_kernel(x_ref, lenm_ref, mask_ref, lab_ref,
                          wih_ref, whh_ref, blstm_ref, wtag_ref, btag_ref,
                          prob_ref, loss_ref, gx_scr, hid_scr,
                          *, hp, pad_id, seq_len):
    Bb, _, E = x_ref.shape
    S = seq_len
    Hp = hp
    Tp = wtag_ref.shape[1]

    # ---- hoisted input projection for BOTH directions: one MXU matmul, staged to VMEM ----
    x2 = x_ref[...].reshape(Bb * S, E)                               # bf16
    gx_scr[...] = (jnp.dot(x2, wih_ref[...], preferred_element_type=jnp.float32)
                   + blstm_ref[...]).reshape(Bb, S, 8 * Hp)

    # validity mask hoisted out of the recurrence (one compute per block)
    valid = lenm_ref[...] > 0.5                                      # (Bb, S, 1) bool

    whh_f = whh_ref[0]                                               # (Hp, 4Hp) bf16
    whh_b = whh_ref[1]
    hf = jnp.zeros((Bb, Hp), jnp.float32)
    cf = jnp.zeros((Bb, Hp), jnp.float32)
    hb = jnp.zeros((Bb, Hp), jnp.float32)
    cb = jnp.zeros((Bb, Hp), jnp.float32)

    # ---- recurrence: fully unrolled static loop (S small & static); per-step h is
    # stored straight into the VMEM scratch so vreg live ranges stay bounded to the
    # four carried state vectors (no Python output lists, no stack/concat epilogue).
    # Gate layout per direction is (i, f, o, g), each gate Hp-wide -> lane-aligned.
    for s in range(S):
        t_f, t_b = s, S - 1 - s

        # forward direction
        rec_f = jnp.dot(hf.astype(jnp.bfloat16), whh_f, preferred_element_type=jnp.float32)
        gates_f = gx_scr[:, t_f, 0:4 * Hp] + rec_f                   # (Bb, 4Hp)
        sig_f = jax.nn.sigmoid(gates_f[:, 0:3 * Hp])
        g_f = jnp.tanh(gates_f[:, 3 * Hp:4 * Hp])
        cf_n = sig_f[:, Hp:2 * Hp] * cf + sig_f[:, 0:Hp] * g_f
        hf_n = sig_f[:, 2 * Hp:3 * Hp] * jnp.tanh(cf_n)
        vf = valid[:, t_f, :]                                        # (Bb, 1)
        cf = jnp.where(vf, cf_n, cf)
        hf = jnp.where(vf, hf_n, hf)
        hid_scr[:, t_f, 0:Hp] = jnp.where(vf, hf, 0.0)               # pad_packed -> zeros

        # backward direction
        rec_b = jnp.dot(hb.astype(jnp.bfloat16), whh_b, preferred_element_type=jnp.float32)
        gates_b = gx_scr[:, t_b, 4 * Hp:8 * Hp] + rec_b
        sig_b = jax.nn.sigmoid(gates_b[:, 0:3 * Hp])
        g_b = jnp.tanh(gates_b[:, 3 * Hp:4 * Hp])
        cb_n = sig_b[:, Hp:2 * Hp] * cb + sig_b[:, 0:Hp] * g_b
        hb_n = sig_b[:, 2 * Hp:3 * Hp] * jnp.tanh(cb_n)
        vb = valid[:, t_b, :]
        cb = jnp.where(vb, cb_n, cb)
        hb = jnp.where(vb, hb_n, hb)
        hid_scr[:, t_b, Hp:2 * Hp] = jnp.where(vb, hb, 0.0)

    # ---- tagging FFN decoder (dropout: eval mode -> identity) ----
    hid2 = hid_scr[...].reshape(Bb * S, 2 * Hp).astype(jnp.bfloat16)
    logits = (jnp.dot(hid2, wtag_ref[...], preferred_element_type=jnp.float32)
              + btag_ref[...])                                       # (Bb*S, Tp)
    mask = mask_ref[...].reshape(Bb * S, 1)
    logits = logits + (1.0 - mask) * _NEG_BIG

    m = jnp.max(logits, axis=-1, keepdims=True)
    e = jnp.exp(logits - m)
    se = jnp.sum(e, axis=-1, keepdims=True)
    prob_ref[...] = (e * pl.reciprocal(se, approx=True)).reshape(Bb, S, Tp)  # lane-dense store

    # cross-entropy partials (sum_nll, count) so batch tiling keeps the exact global mean
    labels = lab_ref[...].reshape(Bb * S, 1)
    lse = m + jnp.log(se)
    tag_iota = jax.lax.broadcasted_iota(jnp.int32, (Bb * S, Tp), 1)
    picked = jnp.sum(jnp.where(tag_iota == labels, logits, 0.0), axis=-1, keepdims=True)
    nll = lse - picked
    is_valid = (labels != pad_id).astype(jnp.float32)
    sum_nll = jnp.sum(nll * is_valid)
    sum_cnt = jnp.sum(is_valid)
    lane = jax.lax.broadcasted_iota(jnp.int32, (1, 1, 128), 2)
    loss_ref[...] = jnp.where(lane == 0, sum_nll, jnp.where(lane == 1, sum_cnt, 0.0))


def bilstm_tagger(x, len_mask, tag_mask, tag_ids,
                  wih, whh, b_lstm, w_tag, b_tag, *, pad_id, block_b):
    B, S, E = x.shape
    Hp = whh.shape[1]
    Tp = w_tag.shape[1]
    assert B % block_b == 0
    nb = B // block_b
    kernel = functools.partial(bilstm_decoder_kernel, hp=Hp, pad_id=pad_id, seq_len=S)
    # NOTE: gx scratch is (block_b, S, 8*Hp) f32 -> choose block_b so it stays well
    # under the per-core VMEM budget (v7x: 64 MiB/TC).  TODO(synk): for very long S
    # move the input projection per time-chunk inside the recurrence.
    prob, parts = pl.pallas_call(
        kernel,
        out_shape=(jax.ShapeDtypeStruct((B, S, Tp), jnp.float32),
                   jax.ShapeDtypeStruct((nb, 1, 128), jnp.float32)),
        grid=(nb,),
        in_specs=[
            pl.BlockSpec((block_b, S, E), lambda b: (b, 0, 0)),
            pl.BlockSpec((block_b, S, 1), lambda b: (b, 0, 0)),
            pl.BlockSpec((block_b, S, 1), lambda b: (b, 0, 0)),
            pl.BlockSpec((block_b, S, 1), lambda b: (b, 0, 0)),
            pl.BlockSpec((E, 8 * Hp), lambda b: (0, 0)),
            pl.BlockSpec((2, Hp, 4 * Hp), lambda b: (0, 0, 0)),
            pl.BlockSpec((1, 8 * Hp), lambda b: (0, 0)),
            pl.BlockSpec((2 * Hp, Tp), lambda b: (0, 0)),
            pl.BlockSpec((1, Tp), lambda b: (0, 0)),
        ],
        out_specs=(
            pl.BlockSpec((block_b, S, Tp), lambda b: (b, 0, 0)),
            pl.BlockSpec((1, 1, 128), lambda b: (b, 0, 0)),
        ),
        scratch_shapes=[
            pltpu.VMEM((block_b, S, 8 * Hp), jnp.float32),   # hoisted gate projection
            pltpu.VMEM((block_b, S, 2 * Hp), jnp.float32),   # per-step hidden states
        ],
        compiler_params=pltpu.CompilerParams(dimension_semantics=("parallel",)),
    )(x, len_mask, tag_mask, tag_ids, wih, whh, b_lstm, w_tag, b_tag)
    # exact global mean (PyTorch CrossEntropyLoss(ignore_index=...) semantics)
    loss = jnp.sum(parts[:, 0, 0]) / jnp.sum(parts[:, 0, 1])
    return prob, loss


# ----------------------------- Full forward -----------------------------
def slu_multihead_forward(prep, input_ids, tag_ids, tag_mask, lengths,
                          *, num_head, num_tags, tag_pad_idx, block_b=1):
    B, S = input_ids.shape
    # embedding lookup (padding_idx=0 row is zero); bf16 activations into the MXU.
    # TODO(synk): embedding gather left to XLA (jnp.take); no simple Pallas win here.
    embed = jnp.take(prep["emb"], input_ids, axis=0).astype(jnp.bfloat16)   # (B, S, E)
    # multi-head self-attention (mask=None, as in the reference forward)
    attn_out, attention = multi_head_attention(
        embed, prep["wqkv"], prep["bqkv"], prep["wout"], prep["bout"], num_head)
    # packed-sequence validity mask (t < length), hoisted to the wrapper (tiny op)
    len_mask = (jnp.arange(S)[None, :] < lengths.astype(jnp.int32)[:, None]
                ).astype(jnp.float32).reshape(B, S, 1)
    # packed bidirectional LSTM (single layer) fused with the tagging decoder
    # TODO(synk): config.num_layer > 1 stacked LSTM not implemented (num_layer=1 here).
    prob_padded, loss = bilstm_tagger(
        attn_out, len_mask,
        tag_mask.astype(jnp.float32).reshape(B, S, 1),
        tag_ids.astype(jnp.int32).reshape(B, S, 1),
        prep["wih"], prep["whh"], prep["b_lstm"], prep["w_tag"], prep["b_tag"],
        pad_id=tag_pad_idx, block_b=block_b)
    prob = prob_padded[..., :num_tags]          # drop lane-padding tag columns
    return prob, loss, attention


# ----------------------------- Parameters -----------------------------
def init_params(key, vocab_size, embed_size, hidden_size, num_tags):
    Hdir = hidden_size // 2
    keys = jax.random.split(key, 12)
    s = 0.1
    emb = s * jax.random.normal(keys[0], (vocab_size, embed_size), jnp.float32)
    emb = emb.at[0].set(0.0)                                                   # padding_idx=0
    return dict(
        emb=emb,
        # qkv columns follow torch layout: per head [q | k | v]
        wqkv=s * jax.random.normal(keys[1], (embed_size, 3 * embed_size), jnp.float32),
        bqkv=s * jax.random.normal(keys[2], (1, 3 * embed_size), jnp.float32),
        wout=s * jax.random.normal(keys[3], (embed_size, embed_size), jnp.float32),
        bout=s * jax.random.normal(keys[4], (1, embed_size), jnp.float32),
        # LSTM weights stored pre-transposed (in, 4H) with PyTorch gate order (i,f,g,o)
        wih_f=s * jax.random.normal(keys[5], (embed_size, 4 * Hdir), jnp.float32),
        whh_f=s * jax.random.normal(keys[6], (Hdir, 4 * Hdir), jnp.float32),
        b_f=s * jax.random.normal(keys[7], (1, 4 * Hdir), jnp.float32),
        wih_b=s * jax.random.normal(keys[8], (embed_size, 4 * Hdir), jnp.float32),
        whh_b=s * jax.random.normal(keys[9], (Hdir, 4 * Hdir), jnp.float32),
        b_b=s * jax.random.normal(keys[10], (1, 4 * Hdir), jnp.float32),
        w_tag=s * jax.random.normal(keys[11], (hidden_size, num_tags), jnp.float32),
        b_tag=jnp.zeros((1, num_tags), jnp.float32),
    )


def preprocess_params(params, *, num_head):
    """Free parameter-load-time transforms: per-head QKV blocks with the softmax
    scale folded into q and head_size zero-padded to a 128-lane multiple, LSTM
    gate reorder (i,f,g,o)->(i,f,o,g) with per-direction hidden padded to 128
    lanes (numerically exact: padded columns are zero), tag dim lane-padded to
    128 (pad logits pinned via the bias), bf16 weight casts for MXU inputs."""
    E = params["wqkv"].shape[0]
    hd = E // num_head
    H = params["whh_f"].shape[0]
    T = params["w_tag"].shape[1]
    hd_p = _round_up(max(hd, 1), 128)
    Hp = _round_up(max(H, 1), 128)
    Tp = _round_up(max(T, 1), 128)

    # --- attention: per-head [q | k | v] blocks, q scaled by 1/sqrt(hd), padded to hd_p
    wqkv = jnp.transpose(params["wqkv"].reshape(E, num_head, 3, hd), (1, 0, 2, 3))
    bqkv = jnp.transpose(params["bqkv"].reshape(1, num_head, 3, hd), (1, 0, 2, 3))
    qscale = jnp.array([1.0 / math.sqrt(hd), 1.0, 1.0], jnp.float32).reshape(1, 1, 3, 1)
    wqkv = wqkv * qscale
    bqkv = bqkv * qscale
    wqkv_p = jnp.zeros((num_head, E, 3, hd_p), jnp.float32).at[..., :hd].set(wqkv)
    bqkv_p = jnp.zeros((num_head, 1, 3, hd_p), jnp.float32).at[..., :hd].set(bqkv)
    wqkv_p = wqkv_p.reshape(num_head, E, 3 * hd_p)
    bqkv_p = bqkv_p.reshape(num_head, 1, 3 * hd_p)
    wout = params["wout"].reshape(num_head, hd, E)
    wout_p = jnp.zeros((num_head, hd_p, E), jnp.float32).at[:, :hd, :].set(wout)

    # --- BiLSTM: gate reorder (i,f,g,o) -> (i,f,o,g), per-gate zero-pad H -> Hp
    def reord_pad(w):                                              # (..., 4H) -> (..., 4Hp)
        i_, f_, g_, o_ = (w[..., 0:H], w[..., H:2 * H],
                          w[..., 2 * H:3 * H], w[..., 3 * H:4 * H])
        out = jnp.zeros(w.shape[:-1] + (4 * Hp,), jnp.float32)
        out = out.at[..., 0 * Hp:0 * Hp + H].set(i_)
        out = out.at[..., 1 * Hp:1 * Hp + H].set(f_)
        out = out.at[..., 2 * Hp:2 * Hp + H].set(o_)
        out = out.at[..., 3 * Hp:3 * Hp + H].set(g_)
        return out

    wih = jnp.concatenate([reord_pad(params["wih_f"]), reord_pad(params["wih_b"])], axis=-1)
    b_lstm = jnp.concatenate([reord_pad(params["b_f"]), reord_pad(params["b_b"])], axis=-1)

    def pad_hh(w):                                                 # (H, 4H) -> (Hp, 4Hp)
        return jnp.zeros((Hp, 4 * Hp), jnp.float32).at[:H, :].set(reord_pad(w))

    whh = jnp.stack([pad_hh(params["whh_f"]), pad_hh(params["whh_b"])], axis=0)  # (2, Hp, 4Hp)

    # --- decoder: rows [fwd H | bwd H] -> [fwd Hp | bwd Hp], tag dim padded to Tp
    w_tag = jnp.zeros((2 * Hp, Tp), jnp.float32)
    w_tag = w_tag.at[0:H, :T].set(params["w_tag"][0:H])
    w_tag = w_tag.at[Hp:Hp + H, :T].set(params["w_tag"][H:2 * H])
    b_tag = jnp.full((1, Tp), _PAD_TAG_BIAS, jnp.float32).at[:, :T].set(params["b_tag"])

    return dict(
        emb=params["emb"],
        wqkv=wqkv_p.astype(jnp.bfloat16), bqkv=bqkv_p,
        wout=wout_p.astype(jnp.bfloat16), bout=params["bout"],
        wih=wih.astype(jnp.bfloat16), whh=whh.astype(jnp.bfloat16), b_lstm=b_lstm,
        w_tag=w_tag.astype(jnp.bfloat16), b_tag=b_tag,
    )


if __name__ == "__main__":
    # small config consistent with the module
    B, S = 2, 8
    vocab_size, embed_size, num_head = 50, 32, 4
    hidden_size, num_tags, tag_pad_idx = 32, 8, 0

    key = jax.random.PRNGKey(0)
    kp, kin, ktag = jax.random.split(key, 3)
    params = init_params(kp, vocab_size, embed_size, hidden_size, num_tags)
    prep = preprocess_params(params, num_head=num_head)

    lengths = jnp.array([8, 5], dtype=jnp.int32)                     # sorted desc (enforce_sorted)
    pos = jnp.arange(S)[None, :]
    valid = pos < lengths[:, None]                                   # (B, S)
    input_ids = jnp.where(valid, jax.random.randint(kin, (B, S), 1, vocab_size), 0).astype(jnp.int32)
    tag_ids = jnp.where(valid, jax.random.randint(ktag, (B, S), 1, num_tags), tag_pad_idx).astype(jnp.int32)
    tag_mask = valid.astype(jnp.float32)

    prob, loss, attention = slu_multihead_forward(
        prep, input_ids, tag_ids, tag_mask, lengths,
        num_head=num_head, num_tags=num_tags, tag_pad_idx=tag_pad_idx,
        block_b=1)                                                   # exercises the batch grid
    jax.block_until_ready((prob, loss, attention))
    assert prob.shape == (B, S, num_tags)
    assert attention.shape == (B, num_head, S, S)
    assert bool(jnp.isfinite(loss))
    print("KERNEL_OK")
</pallas_src>

<mosaic_0001>
module attributes {stable_mosaic.version = 11 : i64} {
  func.func @mha_kernel(%arg0: i32, %arg1: i32, %arg2: memref<1x8x32xbf16, #tpu.memory_space<vmem>>, %arg3: memref<1x32x384xbf16, #tpu.memory_space<vmem>>, %arg4: memref<1x1x384xf32, #tpu.memory_space<vmem>>, %arg5: memref<1x128x32xbf16, #tpu.memory_space<vmem>>, %arg6: memref<1x32xf32, #tpu.memory_space<vmem>>, %arg7: memref<1x8x32xbf16, #tpu.memory_space<vmem>>, %arg8: memref<1x1x8x8xf32, #tpu.memory_space<vmem>>, %arg9: memref<8x32xf32, #tpu.memory_space<vmem>>) attributes {dimension_semantics = [#tpu.dimension_semantics<parallel>, #tpu.dimension_semantics<arbitrary>], iteration_bounds = array<i64: 2, 4>, scalar_prefetch = 0 : i64, scratch_operands = 1 : i64, tpu.core_type = #tpu.core_type<tc>, window_params = [{transform_indices = @transform_0, window_bounds = array<i64: 1, 8, 32>}, {transform_indices = @transform_1, window_bounds = array<i64: 1, 32, 384>}, {transform_indices = @transform_2, window_bounds = array<i64: 1, 1, 384>}, {transform_indices = @transform_3, window_bounds = array<i64: 1, 128, 32>}, {pipeline_mode = #tpu.pipeline_mode<synchronous>, transform_indices = @transform_4, window_bounds = array<i64: 1, 32>}, {transform_indices = @transform_5, window_bounds = array<i64: 1, 8, 32>}, {transform_indices = @transform_6, window_bounds = array<i64: 1, 1, 8, 8>}]} {
    %c0 = arith.constant 0 : index
    %c0_0 = arith.constant 0 : index
    %c0_1 = arith.constant 0 : index
    %0 = vector.load %arg2[%c0, %c0_0, %c0_1] : memref<1x8x32xbf16, #tpu.memory_space<vmem>>, vector<1x8x32xbf16>
    %1 = vector.shape_cast %0 : vector<1x8x32xbf16> to vector<8x32xbf16>
    %c0_2 = arith.constant 0 : index
    %c0_3 = arith.constant 0 : index
    %c0_4 = arith.constant 0 : index
    %2 = vector.load %arg3[%c0_2, %c0_3, %c0_4] : memref<1x32x384xbf16, #tpu.memory_space<vmem>>, vector<1x32x384xbf16>
    %3 = vector.shape_cast %2 : vector<1x32x384xbf16> to vector<32x384xbf16>
    %cst = arith.constant dense<0.000000e+00> : vector<8x384xf32>
    %4 = tpu.matmul %1, %3, %cst {dimension_numbers = #tpu.dot_dimension_numbers<[1], [0], [0], [1], [0, 0, 1, 1], [], []>} : vector<8x32xbf16>, vector<32x384xbf16>, vector<8x384xf32> -> vector<8x384xf32>
    %c0_5 = arith.constant 0 : index
    %c0_6 = arith.constant 0 : index
    %c0_7 = arith.constant 0 : index
    %5 = vector.load %arg4[%c0_5, %c0_6, %c0_7] : memref<1x1x384xf32, #tpu.memory_space<vmem>>, vector<1x1x384xf32>
    %6 = vector.shape_cast %5 : vector<1x1x384xf32> to vector<1x384xf32>
    %7 = vector.broadcast %6 : vector<1x384xf32> to vector<8x384xf32>
    %8 = arith.addf %4, %7 : vector<8x384xf32>
    %9 = vector.extract_strided_slice %8 {offsets = [0, 0], sizes = [8, 128], strides = [1, 1]} : vector<8x384xf32> to vector<8x128xf32>
    %10 = arith.truncf %9 : vector<8x128xf32> to vector<8x128xbf16>
    %11 = vector.extract_strided_slice %8 {offsets = [0, 128], sizes = [8, 128], strides = [1, 1]} : vector<8x384xf32> to vector<8x128xf32>
    %12 = arith.truncf %11 : vector<8x128xf32> to vector<8x128xbf16>
    %13 = vector.extract_strided_slice %8 {offsets = [0, 256], sizes = [8, 128], strides = [1, 1]} : vector<8x384xf32> to vector<8x128xf32>
    %14 = arith.truncf %13 : vector<8x128xf32> to vector<8x128xbf16>
    %cst_8 = arith.constant dense<0.000000e+00> : vector<8x8xf32>
    %15 = tpu.matmul %10, %12, %cst_8 {dimension_numbers = #tpu.dot_dimension_numbers<[1], [1], [0], [0], [0, 0, 1, 0], [], []>} : vector<8x128xbf16>, vector<8x128xbf16>, vector<8x8xf32> -> vector<8x8xf32>
    %cst_9 = arith.constant dense<0xFF800000> : vector<8xf32>
    %16 = vector.multi_reduction <maximumf>, %15, %cst_9 [1] : vector<8x8xf32> to vector<8xf32>
    %17 = vector.shape_cast %16 : vector<8xf32> to vector<8x1xf32>
    %18 = vector.broadcast %17 : vector<8x1xf32> to vector<8x8xf32>
    %19 = arith.subf %15, %18 : vector<8x8xf32>
    %20 = math.exp %19 : vector<8x8xf32>
    %cst_10 = arith.constant dense<0.000000e+00> : vector<8xf32>
    %21 = vector.multi_reduction <add>, %20, %cst_10 [1] : vector<8x8xf32> to vector<8xf32>
    %22 = vector.shape_cast %21 : vector<8xf32> to vector<8x1xf32>
    %23 = tpu.reciprocal %22 {approx = true} : vector<8x1xf32> -> vector<8x1xf32>
    %24 = vector.broadcast %23 : vector<8x1xf32> to vector<8x8xf32>
    %25 = arith.mulf %20, %24 : vector<8x8xf32>
    %26 = vector.shape_cast %25 : vector<8x8xf32> to vector<1x1x8x8xf32>
    %c0_11 = arith.constant 0 : index
    %c0_12 = arith.constant 0 : index
    %c0_13 = arith.constant 0 : index
    %c0_14 = arith.constant 0 : index
    %27 = vector.load %arg8[%c0_11, %c0_12, %c0_13, %c0_14] : memref<1x1x8x8xf32, #tpu.memory_space<vmem>>, vector<1x1x8x8xf32>
    tpu.vector_store %arg8[%c0_11, %c0_12, %c0_13, %c0_14], %26 {strides = array<i32>} : memref<1x1x8x8xf32, #tpu.memory_space<vmem>>, vector<1x1x8x8xf32>,
    %28 = arith.truncf %25 : vector<8x8xf32> to vector<8x8xbf16>
    %cst_15 = arith.constant dense<0.000000e+00> : vector<8x128xf32>
    %29 = tpu.matmul %28, %14, %cst_15 {dimension_numbers = #tpu.dot_dimension_numbers<[1], [0], [0], [1], [0, 0, 1, 1], [], []>} : vector<8x8xbf16>, vector<8x128xbf16>, vector<8x128xf32> -> vector<8x128xf32>
    %c0_i32 = arith.constant 0 : i32
    %30 = arith.cmpi eq, %arg1, %c0_i32 : i32
    %31 = arith.extui %30 : i1 to i32
    %c0_i32_16 = arith.constant 0 : i32
    %32 = arith.cmpi ne, %31, %c0_i32_16 : i32
    scf.if %32 {
      %c0_26 = arith.constant 0 : index
      %c0_27 = arith.constant 0 : index
      %43 = vector.load %arg6[%c0_26, %c0_27] : memref<1x32xf32, #tpu.memory_space<vmem>>, vector<1x32xf32>
      %44 = vector.shape_cast %43 : vector<1x32xf32> to vector<1x32xf32>
      %45 = vector.broadcast %44 : vector<1x32xf32> to vector<8x32xf32>
      %c0_28 = arith.constant 0 : index
      %c0_29 = arith.constant 0 : index
      %46 = vector.load %arg9[%c0_28, %c0_29] : memref<8x32xf32, #tpu.memory_space<vmem>>, vector<8x32xf32>
      tpu.vector_store %arg9[%c0_28, %c0_29], %45 {strides = array<i32>} : memref<8x32xf32, #tpu.memory_space<vmem>>, vector<8x32xf32>,
    } else {
    }
    %c0_17 = arith.constant 0 : index
    %c0_18 = arith.constant 0 : index
    %33 = vector.load %arg9[%c0_17, %c0_18] : memref<8x32xf32, #tpu.memory_space<vmem>>, vector<8x32xf32>
    %34 = arith.truncf %29 : vector<8x128xf32> to vector<8x128xbf16>
    %c0_19 = arith.constant 0 : index
    %c0_20 = arith.constant 0 : index
    %c0_21 = arith.constant 0 : index
    %35 = vector.load %arg5[%c0_19, %c0_20, %c0_21] : memref<1x128x32xbf16, #tpu.memory_space<vmem>>, vector<1x128x32xbf16>
    %36 = vector.shape_cast %35 : vector<1x128x32xbf16> to vector<128x32xbf16>
    %cst_22 = arith.constant dense<0.000000e+00> : vector<8x32xf32>
    %37 = tpu.matmul %34, %36, %cst_22 {dimension_numbers = #tpu.dot_dimension_numbers<[1], [0], [0], [1], [0, 0, 1, 1], [], []>} : vector<8x128xbf16>, vector<128x32xbf16>, vector<8x32xf32> -> vector<8x32xf32>
    %38 = arith.addf %33, %37 : vector<8x32xf32>
    %c0_23 = arith.constant 0 : index
    %c0_24 = arith.constant 0 : index
    %39 = vector.load %arg9[%c0_23, %c0_24] : memref<8x32xf32, #tpu.memory_space<vmem>>, vector<8x32xf32>
    tpu.vector_store %arg9[%c0_23, %c0_24], %38 {strides = array<i32>} : memref<8x32xf32, #tpu.memory_space<vmem>>, vector<8x32xf32>,
    %c3_i32 = arith.constant 3 : i32
    %40 = arith.cmpi eq, %arg1, %c3_i32 : i32
    %41 = arith.extui %40 : i1 to i32
    %c0_i32_25 = arith.constant 0 : i32
    %42 = arith.cmpi ne, %41, %c0_i32_25 : i32
    scf.if %42 {
      %c0_26 = arith.constant 0 : index
      %c0_27 = arith.constant 0 : index
      %43 = vector.load %arg9[%c0_26, %c0_27] : memref<8x32xf32, #tpu.memory_space<vmem>>, vector<8x32xf32>
      %44 = vector.shape_cast %43 : vector<8x32xf32> to vector<1x8x32xf32>
      %45 = arith.truncf %44 : vector<1x8x32xf32> to vector<1x8x32xbf16>
      %c0_28 = arith.constant 0 : index
      %c0_29 = arith.constant 0 : index
      %c0_30 = arith.constant 0 : index
      %46 = vector.load %arg7[%c0_28, %c0_29, %c0_30] : memref<1x8x32xbf16, #tpu.memory_space<vmem>>, vector<1x8x32xbf16>
      tpu.vector_store %arg7[%c0_28, %c0_29, %c0_30], %45 {strides = array<i32>} : memref<1x8x32xbf16, #tpu.memory_space<vmem>>, vector<1x8x32xbf16>,
    } else {
    }
    return
  }
  func.func @transform_0(%arg0: i32, %arg1: i32) -> (i32, i32, i32) {
    %c0_i32 = arith.constant 0 : i32
    %c0_i32_0 = arith.constant 0 : i32
    %c0_i32_1 = arith.constant 0 : i32
    return %arg0, %c0_i32, %c0_i32_0 : i32, i32, i32
  }
  func.func @transform_1(%arg0: i32, %arg1: i32) -> (i32, i32, i32) {
    %c0_i32 = arith.constant 0 : i32
    %c0_i32_0 = arith.constant 0 : i32
    %c0_i32_1 = arith.constant 0 : i32
    return %arg1, %c0_i32, %c0_i32_0 : i32, i32, i32
  }
  func.func @transform_2(%arg0: i32, %arg1: i32) -> (i32, i32, i32) {
    %c0_i32 = arith.constant 0 : i32
    %c0_i32_0 = arith.constant 0 : i32
    %c0_i32_1 = arith.constant 0 : i32
    return %arg1, %c0_i32, %c0_i32_0 : i32, i32, i32
  }
  func.func @transform_3(%arg0: i32, %arg1: i32) -> (i32, i32, i32) {
    %c0_i32 = arith.constant 0 : i32
    %c0_i32_0 = arith.constant 0 : i32
    %c0_i32_1 = arith.constant 0 : i32
    return %arg1, %c0_i32, %c0_i32_0 : i32, i32, i32
  }
  func.func @transform_4(%arg0: i32, %arg1: i32) -> (i32, i32) {
    %c0_i32 = arith.constant 0 : i32
    %c0_i32_0 = arith.constant 0 : i32
    %c0_i32_1 = arith.constant 0 : i32
    return %c0_i32, %c0_i32_0 : i32, i32
  }
  func.func @transform_5(%arg0: i32, %arg1: i32) -> (i32, i32, i32) {
    %c0_i32 = arith.constant 0 : i32
    %c0_i32_0 = arith.constant 0 : i32
    %c0_i32_1 = arith.constant 0 : i32
    return %arg0, %c0_i32, %c0_i32_0 : i32, i32, i32
  }
  func.func @transform_6(%arg0: i32, %arg1: i32) -> (i32, i32, i32, i32) {
    %c0_i32 = arith.constant 0 : i32
    %c0_i32_0 = arith.constant 0 : i32
    %c0_i32_1 = arith.constant 0 : i32
    return %arg0, %arg1, %c0_i32, %c0_i32_0 : i32, i32, i32, i32
  }
}

</mosaic_0001>

<bundles_post_ra>
// kernel: tpu_custom_call.1
= control target key start
LH: loop header
LB: loop body
LE: loop exit
PB: predicated region body
PF: predicated region fallthrough
CT: control target
= control target key end

     0   :  { %s1566_s0 = inlined_call_operand.vmem [shape: bf16[2,8,32], index: 0, kind: input, shape index: {}]   ;;  %s1567_s1 = inlined_call_operand.vmem [shape: bf16[4,32,384], index: 1, kind: input, shape index: {}]   ;;  %s1568_s2 = inlined_call_operand.vmem [shape: f32[4,1,384], index: 2, kind: input, shape index: {}]   ;;  %s1569_s3 = inlined_call_operand.vmem [shape: bf16[4,128,32], index: 3, kind: input, shape index: {}]   ;;  %s1570_s4 = inlined_call_operand.vmem [shape: f32[1,32], index: 4, kind: input, shape index: {}]   ;;  %s1571_s5 = inlined_call_operand.hbm [shape: bf16[2,8,32], index: 5, kind: output, shape index: {0}]   ;;  %s1572_s6 = inlined_call_operand.hbm [shape: f32[2,4,8,8], index: 6, kind: output, shape index: {1}]  }
   0x1   :  { %1583 = sst [smem:[#allocation19_spill]] %s1566_s0 }
   0x2   :  { %12 = vsyncpa [#allocation4], 0 }
   0x3   :  { %14 = vsyncpa [#allocation4 + $0x1], 0 }
   0x4   :  { %15 = vsyncpa [#allocation6], 0 }
   0x5   :  { %17 = vsyncpa [#allocation6 + $0x1], 0  ;;  %s1287_s21 = smov 0   ;;  %s1289_s22 = smov 0  }
   0x6   :  { %s1291_s23 = smov 0   ;;  %s1293_s24 = smov 0  }
   0x7   :  { %s1295_s25 = smov 0   ;;  %s1297_s26 = smov 0  }
   0x8   :  { %s1299_s27 = smov 0   ;;  %s1301_s28 = smov 0  }
   0x9   :  { %s1303_s29 = smov 0   ;;  %s1305_s30 = smov 0  }
   0xa   :  { %s1307_s7 = smov 0  }
   0xb LB: > { %1584 = sst [smem:[#allocation9_spill]] %s1205_s21  ;;  %s879_s8 = sadd.s32 4294967295, %s1245_s7   ;;  %s1245_s7 = sphi %s1307_s7, %s23_s7   ;;  %s1241_s30 = sphi %s1305_s30, %s1614_s30   ;;  %s1237_s29 = sphi %s1303_s29, %s1613_s29   ;;  %s1233_s28 = sphi %s1301_s28, %s1612_s28   ;;  %s1229_s27 = sphi %s1299_s27, %s1611_s27   ;;  %s1225_s26 = sphi %s1297_s26, %s1610_s26   ;;  %s1221_s25 = sphi %s1295_s25, %s1618_s25   ;;  %s1217_s24 = sphi %s1293_s24, %s1617_s24   ;;  %s1213_s23 = sphi %s1291_s23, %s1608_s23   ;;  %s1209_s22 = sphi %s1289_s22, %s1616_s22   ;;  %s1205_s21 = sphi %s1287_s21, %s1615_s21  }
   0xc   : > { %1585 = sst [smem:[#allocation10_spill]] %s1213_s23  ;;  %s880_s9 = sadd.s32 4294967294, %s1245_s7  }
   0xd   : > { %1586 = sst [smem:[#allocation11_spill]] %s1225_s26  ;;  %s32_s10 = sadd.s32 1, %s1237_s29 }
   0xe   : > { %1587 = sst [smem:[#allocation12_spill]] %s1237_s29  ;;  %s35_s11 = sadd.s32 1, %s1241_s30 }
   0xf   : > { %1588 = sst [smem:[#allocation13_spill]] %s1241_s30  ;;  %p33_p0 = scmp.ge.s32.totalorder %s32_s10, 4 }
  0x10   : > { %s167_s12 = sadd.s32 1, %s1225_s26  ;;  %p177_p1 = scmp.ne.s32.totalorder %s1225_s26, %s1221_s25 }
  0x11   : > { %p1349_p2 = scmp.eq.s32.totalorder %s879_s8, 7  ;;  %s1620_s10 = smov (%p33_p0, %s32_s10), 0 }
  0x12   : > { %1590 = sst [smem:[#allocation14_spill]] %s1620_s10  ;;  %s1622_s11 = smov (!%p33_p0, %s35_s11), %s1241_s30 }
  0x13   : > { %p1358_p3 = por %p1349_p2, %p177_p1  ;;  %p183_p4 = scmp.ne.s32.totalorder %s1221_s25, %s1217_s24 }
  0x14   : > { %p37_p5 = scmp.ge.s32.totalorder %s1622_s11, 2  ;;  %p1364_p6 = scmp.eq.s32.totalorder %s880_s9, 7 }
  0x15   : > { %s191_s16 = ssub.s32 %s1237_s29, %s1620_s10  ;;  %s195_s17 = sadd.s32 1, %s1213_s23 }
  0x16   : > { %s1624_s11 = smov (%p37_p5, %s1622_s11), 0  ;;  %p1375_p7 = por %p1364_p6, %p183_p4 }
  0x17   : > { %1593 = sst [smem:[#allocation15_spill]] %s1624_s11  ;;  %p205_p8 = scmp.ne.s32.totalorder %s1213_s23, %s1209_s22 }
  0x18   : > { %s1594_s18 = scalar_select %p1375_p7, 1, 0 }
  0x19   : > { %s164_s19 = ssub.s32 %s1241_s30, %s1624_s11  ;;  %p211_p9 = scmp.ne.s32.totalorder %s1209_s22, %s1205_s21 }
  0x1a   : > { %p165_p10 = scmp.eq.s32.totalorder %s164_s19, 0  ;;  %s192_s20 = sor.u32 %s191_s16, %s164_s19 }
  0x1b   : > { %p193_p11 = scmp.eq.s32.totalorder %s192_s20, 0  ;;  %p1387_p12 = por %p205_p8, %p1349_p2 }
  0x1c   : > { %s1392_s9 = scalar_select %p165_p10, %s1225_s26, %s167_s12  }
  0x1d   : > { %s1395_s10 = scalar_select %p193_p11, %s1213_s23, %s195_s17  }
  0x1e   : > { %1596 = sst [smem:[#allocation16_spill]] %s1392_s9  ;;  %p1399_p13 = por %p211_p9, %p1364_p6 }
  0x1f   : > { %1597 = sst [smem:[#allocation17_spill]] %s1395_s10  ;;  %p883_p0 = scmp.ge.s32.totalorder %s1245_s7, 1 }
  0x20   : > { %s1598_s29 = scalar_select %p1399_p13, 1, 0 }
  0x21   : > { %p263_p1 = scmp.lt.s32.totalorder %s1245_s7, 9 }
  0x22   : > { %1599 = sst [smem:[#allocation18_spill]] %s1598_s29 }
  0x23   : > { %p264_p4 = pnand %p883_p0, %p263_p1 }
  0x24   : > { %s1578_s13 = sand.u32 (!%p264_p4), 1, %s1221_s25   ;;  %p315_p2 = scmp.lt.s32.totalorder (!%p264_p4), %s1229_s27, 3 }
  0x25   : > { %267 = sbr.rel (%p264_p4) target bundleno = 1257 (0x4e9), region = 40  ;;  %s1409_s12 = sshll.u32 (!%p264_p4), %s1578_s13, 2 }
  0x26   : > { %p311_p5 = scmp.lt.s32.totalorder (!%p264_p4), %s1233_s28, 1  ;;  %s1600_s0 = sld [smem:[#allocation19_spill]] (!%p264_p4) }
  0x27   : > { %p899_p6 = scmp.ne.s32.totalorder (!%p264_p4), %s1229_s27, 0 }
  0x2a   : > { %v1247_v0 = vmov 0   ;;  %s1413_s15 = scalar_select %p315_p2, %s1229_s27, 3  ;;  %vm388_vm0 = vcmask 261120   ;;  %v1248_v7 = vmov 0.0   ;;  %vm1249_vm1 = vmmov 0  }
  0x2b   : > { %424 = vmatprep.mubr.bf16.mxu1 %v1247_v0  ;;  %s312_s16 = scalar_select %p311_p5, %s1233_s28, 1  ;;  %v341_v9 = vlaneseq  ;;  %vm533_vm2 = vcmask 1043456   ;;  %vm516_vm3 = vcmask 64512  }
  0x2c   : > { %s974_s17 = smul.u32 48, %s1413_s15  ;;  %s917_s19 = sshll.u32 %s1413_s15, 6 }
  0x2d   : > { %s1421_s30 = scalar_lea.vmem %s1569_s3, %s917_s19  ;;  %s886_s10 = sshll.u32 %s312_s16, 2  ;;  %v342_v10 = vshrl.u32 %v341_v9, 7 }
  0x2e   : > { %s319_s13 = scalar_lea.vmem %s1567_s1, %s974_s17  ;;  %s314_s21 = scalar_lea.vmem %s1600_s0, %s886_s10 }
  0x2f   : > { %v1079_v1 = vld [vmem:[%s319_s13 + $0x1c] ss:$12 sps:$4 sm:$0xff]   ;;  %v1081_v2 = vld [vmem:[%s319_s13 + $0x18] ss:$12 sps:$4 sm:$0xff]   ;;  %v1084_v4 = vld [vmem:[%s319_s13] ss:$12 sps:$4 sm:$0xff]  }
  0x30   : > { %404 = vmatprep.subr.bf16.mxu1 %v1079_v1  ;;  %v1082_v3 = vld [vmem:[%s319_s13 + $0x4] ss:$12 sps:$4 sm:$0xff]   ;;  %v330_v5 = vld [vmem:[%s314_s21] sm:$0xf]  ;;  %v1086_v8 = vld [vmem:[%s319_s13 + $0x8] ss:$12 sps:$4 sm:$0xff]  }
  0x31   : > { %405 = vmatpush1.bf16.msra.mxu1 %v1081_v2  ;;  %v1085_v6 = vld [vmem:[%s319_s13 + $0x20] ss:$12 sps:$4 sm:$0xff]   ;;  %s975_s21 = smul.u32 3, %s1413_s15  ;;  %v347_v11 = vsub.s32 1, %v342_v10  ;;  %v343_v14 = vsub.s32 0, %v342_v10  ;;  %v351_v24 = vsub.s32 2, %v342_v10 }
  0x32   : > { %406 = vmatprep.subr.bf16.mxu1 %v1082_v3  ;;  %s1582_s10 = sand.u32 1, %s1209_s22   ;;  %s303_s13 = scalar_lea.vmem [#allocation3], %s1409_s12 }
  0x33   : > { %s323_s29 = scalar_lea.vmem %s1568_s2, %s975_s21  ;;  %s1450_s11 = sshll.u32 %s1582_s10, 3 }
  0x34   : > { %v339_v12 = vld [vmem:[%s323_s29] sm:$0x7]  ;;  %s310_s9 = scalar_lea.vmem [#allocation5], %s1450_s11 }
  0x35   : > { %407 = vmatpush1.bf16.msra.mxu1 %v1084_v4  ;;  %v348_v13 = vrot.slane %v339_v12, %v347_v11  ;;  %v344_v18 = vrot.slane %v339_v12, %v343_v14  ;;  %v352_v25 = vrot.slane %v339_v12, %v351_v24 }
  0x36   : > { %934 = vmatprep.subr.bf16.mxu1 %v1248_v7 }
  0x38   : > { %896 = vmatmul.mubr.msk.bf16.vlgmr.msra.gmra.mxu1 %vm388_vm0, %v330_v5 }
  0x39   : > { %935 = vmatpush3.bf16.msra.mxu1 %v1085_v6  ;;  %938 = vmatprep.mubr.msk.bf16.mxu1 %vm1249_vm1, %v1248_v7 }
  0x3a   : > { %936 = vmatprep.subr.bf16.mxu1 %v1248_v7 }
  0x3d   : > { %937 = vmatpush3.bf16.msra.mxu1 %v1086_v8 }
  0x3e   : > { %942 = vmatprep.subr.bf16.mxu1 %v1248_v7 }
  0x40   : > { %939 = vmatmul.mubr.msk.bf16.vlgmr.msra.gmra.mxu1 %vm388_vm0, %v330_v5 }
  0x41   : > { %944 = vmatprep.mubr.msk.bf16.mxu1 %vm1249_vm1, %v1248_v7 }
  0xf8   : > { %v426_v15 = vpop.f32.mrf.mxu1 }
  0xf9   : > { %v427_v22 = vadd.f32 %v426_v15, %v344_v18 }
  0xfa   : > { %v428_v16 = vpop.f32.mrf.mxu1 }
  0xfb   : > { %v429_v17 = vadd.f32 %v428_v16, %v348_v13  ;;  %v473_v23 = vpack.c.bf16 %v427_v22, %v427_v22 }
  0xfc   : > { %v430_v19 = vpop.f32.mrf.mxu1 }
  0xfd   : > { %v474_v20 = vpack.c.bf16 %v429_v17, %v429_v17 }
  0xfe   : > { %v431_v21 = vpop.f32.mrf.mxu1 }
  0xff   : > { %943 = vmatpush3.bf16.xpose.msra.mxu1 %v474_v20 }
 0x100   : > { %948 = vmatprep.subr.bf16.mxu1 %v1248_v7  ;;  %v467_v26 = vpop.f32.mrf.mxu1 }
 0x101   : > { %v468_v27 = vadd.f32 %v467_v26, %v352_v25 }
 0x102   : > { %v940_v28 = vpop.f32.mrf.mxu1 }
 0x103   : > { %v475_v29 = vpack.c.bf16 %v468_v27, %v468_v27 }
 0x104   : > { %v470_v30 = vpop.f32.mrf.mxu1 }
 0x105   : > { %v535_v31 = vsel %vm533_vm2, %v475_v29, 0 }
 0x106   : > { %945 = vmatmul.mubr.bf16.vlgmr.msra.gmra.mxu1 %v473_v23  ;;  %v941_v32 = vpop.f32.mrf.mxu1 }
 0x107   : > { %950 = vmatprep.mubr.msk.bf16.mxu1 %vm1249_vm1, %v1248_v7  ;;  %949 = vmatpush3.bf16.msra.mxu1 %v535_v31 }
 0x1c6   : > { %v510_v33 = vpop.f32.mrf.mxu1 }
 0x1c7   : > { %v517_v34 = vsel %vm516_vm3, %v510_v33, -inf }
 0x1c8   : > { %518 = vmax.xlane.f32.xlu0 %v517_v34  ;;  %v946_v35 = vpop.f32.mrf.mxu1 }
 0x1ca   : > { %v513_v36 = vpop.f32.mrf.mxu1 }
 0x1cc   : > { %v947_v37 = vpop.f32.mrf.mxu1 }
 0x251   : > { %v519_v38 = vpop.xlane.xlu0 %518 }
 0x252   : > { %v520_v39 = vsub.f32 %v510_v33, %v519_v38 }
 0x254   : > { %v521_v40 = vmul.f32 1.442695, %v520_v39 }
 0x256   : > { %1087 = vpow2.f32 %v521_v40 }
 0x263   : > { %v1088_v41 = vpop.eup %1087 }
 0x264   : > { %v523_v42 = vsel %vm516_vm3, %v1088_v41, 0.0 }
 0x265   : > { %524 = vadd.xlane.f32.xlu0 %v523_v42 }
 0x2ee   : > { %v525_v43 = vpop.xlane.xlu0 %524 }
 0x2ef   : > { %1089 = vrcp.f32 %v525_v43 }
 0x2fc   : > { %v1090_v44 = vpop.eup %1089 }
 0x2fd   : > { %v527_v45 = vmul.f32 %v1090_v44, %v1088_v41 }
 0x2ff   : > { %528 = vst.msk [vmem:[%s310_s9] sm:$0xff] %vm516_vm3, %v527_v45  ;;  %v529_v46 = vpack.c.bf16 %v527_v45, %v527_v45 }
 0x301   : > { %951 = vmatmul.mubr.msk.bf16.vlgmr.msra.gmra.mxu1 %vm516_vm3, %v529_v46 }
 0x3c1   : > { %v571_v47 = vpop.f32.mrf.mxu1 }
 0x3c3   : > { %v952_v48 = vpop.f32.mrf.mxu1  ;;  %580 = sbr.rel (%p899_p6) target bundleno = 970 (0x3ca), region = 44 }
 0x3c5   : > { %v574_v49 = vpop.f32.mrf.mxu1 }
 0x3c7   : > { %v953_v50 = vpop.f32.mrf.mxu1 }
 0x3c8   : > { %v900_v51 = vld [vmem:[%s1570_s4] ss:$0 sm:$0xff] }
 0x3c9   : > { %588 = vst.msk [vmem:[#allocation2] sm:$0xff] %vm388_vm0, %v900_v51 }
 0x3ca PF: > { %954 = vmatprep.subr.bf16.mxu0 %v1248_v7  ;;  %v1091_v52 = vld [vmem:[%s1421_s30 + $0x38] sm:$0xff]   ;;  %970 = vmatprep.mubr.msk.bf16.mxu0 %vm1249_vm1, %v1248_v7  ;;  %v1092_v53 = vld [vmem:[%s1421_s30 + $0x30] sm:$0xff]   ;;  %v1093_v54 = vld [vmem:[%s1421_s30 + $0x28] sm:$0xff]   ;;  %v590_v60 = vpack.c.bf16 %v571_v47, %v571_v47  ;;  %p909_p8 = scmp.ne.s32.totalorder %s1229_s27, 3 }
 0x3cb   : > { %955 = vmatpush3.bf16.msra.mxu0 %v1091_v52  ;;  %v1094_v55 = vld [vmem:[%s1421_s30 + $0x20] sm:$0xff]   ;;  %v1095_v56 = vld [vmem:[%s1421_s30 + $0x18] sm:$0xff]   ;;  %v1096_v57 = vld [vmem:[%s1421_s30 + $0x10] sm:$0xff]  }
 0x3cc   : > { %956 = vmatprep.subr.bf16.mxu0 %v1248_v7  ;;  %v1097_v58 = vld [vmem:[%s1421_s30 + $0x8] sm:$0xff]   ;;  %v1098_v59 = vld [vmem:[%s1421_s30] sm:$0xff]  }
 0x3cf   : > { %957 = vmatpush3.bf16.msra.mxu0 %v1092_v53 }
 0x3d0   : > { %958 = vmatprep.subr.bf16.mxu0 %v1248_v7  ;;  %v589_v61 = vld [vmem:[#allocation2] sm:$0xff] }
 0x3d3   : > { %959 = vmatpush3.bf16.msra.mxu0 %v1093_v54 }
 0x3d4   : > { %960 = vmatprep.subr.bf16.mxu0 %v1248_v7 }
 0x3d7   : > { %961 = vmatpush3.bf16.msra.mxu0 %v1094_v55 }
 0x3d8   : > { %962 = vmatprep.subr.bf16.mxu0 %v1248_v7 }
 0x3db   : > { %963 = vmatpush3.bf16.msra.mxu0 %v1095_v56 }
 0x3dc   : > { %964 = vmatprep.subr.bf16.mxu0 %v1248_v7 }
 0x3df   : > { %965 = vmatpush3.bf16.msra.mxu0 %v1096_v57 }
 0x3e0   : > { %966 = vmatprep.subr.bf16.mxu0 %v1248_v7 }
 0x3e3   : > { %967 = vmatpush3.bf16.msra.mxu0 %v1097_v58 }
 0x3e4   : > { %968 = vmatprep.subr.bf16.mxu0 %v1248_v7 }
 0x3e7   : > { %969 = vmatpush3.bf16.msra.mxu0 %v1098_v59 }
 0x3ea   : > { %971 = vmatmul.mubr.bf16.vlgmr.msra.gmra.mxu0 %v590_v60 }
 0x4aa   : > { %v689_v62 = vpop.f32.mrf.mxu0 }
 0x4ab   : > { %v695_v63 = vadd.f32 %v689_v62, %v589_v61 }
 0x4ac   : > { %v972_v0 = vpop.f32.mrf.mxu0  ;;  %700 = sbr.rel (%p909_p8) target bundleno = 1208 (0x4b8), region = 48 }
 0x4ad   : > { %696 = vst.msk [vmem:[#allocation2] sm:$0xff] %vm388_vm0, %v695_v63 }
 0x4ae   : > { %v692_v1 = vpop.f32.mrf.mxu0 }
 0x4b0   : > { %v973_v2 = vpop.f32.mrf.mxu0 }
 0x4b1   : > { %vm703_vm4 = vcmask 257024  }
 0x4b4   : > { %v701_v3 = vld [vmem:[#allocation2] sm:$0xff] }
 0x4b5   : > { %v702_v4 = vpack.c.bf16 %v701_v3, %v701_v3 }
 0x4b7   : > { %704 = vst.msk [vmem:[%s303_s13] sm:$0xf] %vm703_vm4, %v702_v4 }
 0x4b8 PF: > { %s912_s30 = sshll.u32 %s1233_s28, 6  ;;  %s724_s21 = sshll.u32 %s303_s13, 4  ;;  %s725_s21 = int_to_ptr.vmem [resolvable:$true] %s724_s21 }
 0x4b9   : > { %s722_s20 = scalar_lea.hbm %s1571_s5, %s912_s30  ;;  %s1601_s23 = sand.u32 1, %s1221_s25  }
 0x4ba   : > { %s706_s26 = scalar_lea.sflag [#allocation4], %s1601_s23  ;;  %s1099_s29 = scalar_lea.vmem %s725_s21, 64 }
 0x4bb   : > { %p1100_p9 = scmp.ne.s32.totalorder %s725_s21, %s1099_s29  ;;  %s1250_s15 = smov [#allocation3]  }
 0x4bc   : > { %s1103_s16 = sshll.u32 %s1250_s15, 4  ;;  %s1104_s16 = int_to_ptr.vmem [resolvable:$false] %s1103_s16 }
 0x4bd   : > { %p1101_p10 = pnand %p1100_p9, %p1358_p3  ;;  %s1105_s10 = scalar_lea.vmem %s1104_s16, 128 }
 0x4be   : > { %p1106_p0 = scmp.lt.s32.totalorder %s725_s21, %s1104_s16  ;;  %p1107_p1 = scmp.lt.s32.totalorder %s1105_s10, %s1099_s29 }
 0x4bf   : > { %p1102_p11 = pneg %p1101_p10 }
 0x4c0   : > { %p1108_p4 = por %p1107_p1, %p1106_p0 }
 0x4c2   : > { %p1109_p2 = pnand %p1108_p4, %p1102_p11 }
 0x4c4   : > { %1112 = shalt.err (!%p1109_p2)
}
 0x4c5   : > { %s1113_s30 = scalar_lea.hbm %s722_s20, 64  ;;  %s1117_s17 = scalar_lea.hbm %s1571_s5, 128 }
 0x4c6   : > { %p1114_p5 = scmp.ne.s32.totalorder %s722_s20, %s1113_s30  ;;  %p1118_p9 = scmp.lt.s32.totalorder %s722_s20, %s1571_s5 }
 0x4c7   : > { %p1119_p10 = scmp.lt.s32.totalorder %s1117_s17, %s1113_s30 }
 0x4c8   : > { %p1115_p6 = pnand %p1114_p5, %p1358_p3 }
 0x4c9   : > { %p1120_p13 = por %p1119_p10, %p1118_p9 }
 0x4ca   : > { %p1116_p8 = pneg %p1115_p6 }
 0x4cc   : > { %p1121_p7 = pnand %p1120_p13, %p1116_p8 }
 0x4ce   : > { %1124 = shalt.err (!%p1121_p7)
}
 0x4cf   : > { %976 = dma.vmem_to_hbm [thread:$0]  (%p1358_p3), %s725_s21, 64, %s722_s20, %s706_s26  }
 0x4d0   : > { %s913_s10 = sshll.u32 %s1233_s28, 2  ;;  %s739_s29 = sshll.u32 %s310_s9, 4  ;;  %s740_s29 = int_to_ptr.vmem [resolvable:$true] %s739_s29 }
 0x4d1   : > { %s735_s15 = sadd.s32 %s1229_s27, %s913_s10  ;;  %s1602_s17 = sand.u32 1, %s1209_s22  }
 0x4d2   : > { %s914_s16 = sshll.u32 %s735_s15, 7  ;;  %s711_s19 = scalar_lea.sflag [#allocation6], %s1602_s17 }
 0x4d3   : > { %s737_s30 = scalar_lea.hbm %s1572_s6, %s914_s16  ;;  %s1125_s23 = scalar_lea.vmem %s740_s29, 128 }
 0x4d4   : > { %p1126_p7 = scmp.ne.s32.totalorder %s740_s29, %s1125_s23  ;;  %s1251_s14 = smov [#allocation5]  }
 0x4d5   : > { %s1129_s0 = sshll.u32 %s1251_s14, 4  ;;  %s1130_s0 = int_to_ptr.vmem [resolvable:$false] %s1129_s0 }
 0x4d6   : > { %p1127_p13 = pnand %p1126_p7, %p1387_p12  ;;  %s1131_s28 = scalar_lea.vmem %s1130_s0, 256 }
 0x4d7   : > { %p1132_p3 = scmp.lt.s32.totalorder %s740_s29, %s1130_s0  ;;  %p1133_p0 = scmp.lt.s32.totalorder %s1131_s28, %s1125_s23 }
 0x4d8   : > { %p1128_p11 = pneg %p1127_p13 }
 0x4d9   : > { %p1134_p1 = por %p1133_p0, %p1132_p3 }
 0x4db   : > { %p1135_p4 = pnand %p1134_p1, %p1128_p11 }
 0x4dd   : > { %1138 = shalt.err (!%p1135_p4)
}
 0x4de   : > { %s1139_s27 = scalar_lea.hbm %s737_s30, 128  ;;  %s1143_s20 = scalar_lea.hbm %s1572_s6, 1024 }
 0x4df   : > { %p1140_p2 = scmp.ne.s32.totalorder %s737_s30, %s1139_s27  ;;  %p1144_p8 = scmp.lt.s32.totalorder %s737_s30, %s1572_s6 }
 0x4e0   : > { %p1145_p9 = scmp.lt.s32.totalorder %s1143_s20, %s1139_s27 }
 0x4e1   : > { %p1141_p5 = pnand %p1140_p2, %p1387_p12 }
 0x4e2   : > { %p1146_p10 = por %p1145_p9, %p1144_p8 }
 0x4e3   : > { %p1142_p6 = pneg %p1141_p5 }
 0x4e5   : > { %p1147_p7 = pnand %p1146_p10, %p1142_p6 }
 0x4e7   : > { %1150 = shalt.err (!%p1147_p7)
}
 0x4e8   : > { %977 = dma.vmem_to_hbm [thread:$0]  (%p1387_p12), %s740_s29, 128, %s737_s30, %s711_s19  }
 0x4e9 PF: > { %p987_p13 = scmp.ge.s32.totalorder %s1245_s7, 2  ;;  %s751_s0 = sand.u32 1, %s1217_s24  }
 0x4ea   : > { %p1603_p11 = scmp.ne.s32.totalorder %s1594_s18, 0  ;;  %s752_s10 = scalar_lea.sflag [#allocation4], %s751_s0 }
 0x4ec   : > { %p981_p3 = pnand %p987_p13, %p1603_p11 }
 0x4ee   : > { %p982_p0 = pneg %p981_p3 }
 0x4f0   : > { %1196 = dma.done.wait (%p982_p0), %s752_s10, 64  }
 0x4f1   : > { %1198 = vsyncadd (%p982_p0), %s752_s10, 4294967232  ;;  %s1604_s15 = sld [smem:[#allocation9_spill]] }
 0x4f2   : > { %s1605_s16 = sld [smem:[#allocation18_spill]] }
 0x4f7   : > { %s760_s12 = sand.u32 1, %s1604_s15  }
 0x4f8   : > { %p1606_p1 = scmp.ne.s32.totalorder %s1605_s16, 0  ;;  %s761_s8 = scalar_lea.sflag [#allocation6], %s760_s12 }
 0x4fa   : > { %p984_p4 = pnand %p987_p13, %p1606_p1 }
 0x4fc   : > { %p985_p2 = pneg %p984_p4 }
 0x4fe   : > { %1200 = dma.done.wait (%p985_p2), %s761_s8, 128  }
 0x4ff   : > { %1202 = vsyncadd (%p985_p2), %s761_s8, 4294967168  ;;  %s23_s7 = sadd.s32 1, %s1245_s7   ;;  %s1607_s24 = sld [smem:[#allocation10_spill]] }
 0x500   : > { %p20_p12 = scmp.ge.s32.totalorder %s23_s7, 10   ;;  %s1608_s23 = sld [smem:[#allocation17_spill]] }
 0x501   : > { %s1609_s18 = sld [smem:[#allocation11_spill]]  ;;  %s1615_s21 = smov %s1209_s22 }
 0x502   : > { %s1610_s26 = sld [smem:[#allocation16_spill]] }
 0x503   : > { %s1611_s27 = sld [smem:[#allocation12_spill]]  ;;  %22 = sbr.rel (!%p20_p12) target bundleno = 11 (0xb), region = 109 }
 0x504   : > { %s1612_s28 = sld [smem:[#allocation13_spill]] }
 0x505   : > { %s1613_s29 = sld [smem:[#allocation14_spill]]  ;;  %s1616_s22 = smov %s1607_s24 }
 0x506   : > { %s1614_s30 = sld [smem:[#allocation15_spill]]  ;;  %s1617_s24 = smov %s1221_s25 }
 0x507   : > { %s1618_s25 = smov %s1609_s18 }
 0x508   :  { %766 = vsyncpa [#allocation4], 1 }
 0x509   :  { %768 = vsyncpa [#allocation4 + $0x1], 1 }
 0x50a   :  { %769 = vsyncpa [#allocation6], 1 }
 0x50b   :  { %771 = vsyncpa [#allocation6 + $0x1], 1 }

</bundles_post_ra>
